<compile_context>
chip_gen: v5e
topology: v5e:2x2
jax: 0.10.0
libtpu: 0.0.40
codegen_flags: <defaults>
</compile_context>

<pallas_src>
import functools

import jax
import jax.numpy as jnp
from jax.experimental import pallas as pl
from jax.experimental.pallas import tpu as pltpu

NDF = 64
_NEG_SLOPE = 0.2
_BN_EPS = 1e-5


# ----------------------------------------------------------------------------
# Pallas kernels
# ----------------------------------------------------------------------------
def _matmul_kernel(a_ref, b_ref, o_ref, acc_ref, *, apply_lrelu, neg_slope):
    """Tiled matmul C = A @ B (bf16 in, fp32 accumulate) with optional fused LeakyReLU."""
    @pl.when(pl.program_id(2) == 0)
    def _():
        acc_ref[...] = jnp.zeros_like(acc_ref)

    acc_ref[...] += jnp.dot(a_ref[...], b_ref[...],
                            preferred_element_type=jnp.float32)

    @pl.when(pl.program_id(2) == pl.num_programs(2) - 1)
    def _():
        acc = acc_ref[...]
        if apply_lrelu:
            acc = jnp.where(acc >= 0, acc, neg_slope * acc)
        o_ref[...] = acc.astype(o_ref.dtype)


def _bn_stats_kernel(y_ref, sum_ref, sq_ref):
    """Accumulate per-channel sum / sum-of-squares over the M (row) grid axis."""
    @pl.when(pl.program_id(0) == 0)
    def _():
        sum_ref[...] = jnp.zeros_like(sum_ref)
        sq_ref[...] = jnp.zeros_like(sq_ref)

    y = y_ref[...].astype(jnp.float32)
    sum_ref[...] += jnp.sum(y, axis=0, keepdims=True)
    sq_ref[...] += jnp.sum(y * y, axis=0, keepdims=True)


def _bn_apply_kernel(y_ref, scale_ref, shift_ref, o_ref, *, neg_slope):
    """out = LeakyReLU(y * scale + shift); normalize + affine folded into scale/shift."""
    y = y_ref[...].astype(jnp.float32)
    out = y * scale_ref[...] + shift_ref[...]
    o_ref[...] = jnp.where(out >= 0, out, neg_slope * out).astype(o_ref.dtype)


def _final_dot_kernel(a_ref, w_ref, o_ref):
    """Final 512->1 conv as a VPU multiply + lane reduction (M and N are tiny)."""
    a = a_ref[...].astype(jnp.float32)            # [M, K]
    w = w_ref[...].astype(jnp.float32)            # [1, K]
    o_ref[...] = jnp.sum(a * w, axis=-1, keepdims=True)


# ----------------------------------------------------------------------------
# Wrappers
# ----------------------------------------------------------------------------
def _pick_tile(dim, cap, align):
    """Largest `align`-aligned tile <= cap that divides `dim` exactly.
    Falls back to the full dim (always a legal block size)."""
    if dim <= cap:
        return dim
    t = (cap // align) * align
    while t >= align:
        if dim % t == 0:
            return t
        t -= align
    return dim


def pallas_matmul(a, b, apply_lrelu, *, out_dtype=jnp.bfloat16, neg_slope=_NEG_SLOPE):
    """C[M,N] = A[M,K] @ B[K,N] on the MXU.  Shape-aware tiles, no padding, bf16 inputs."""
    m, k = a.shape
    k2, n = b.shape
    assert k == k2
    tm = _pick_tile(m, 256, 8)       # >=2 parallel M tiles on the big layers (megacore)
    tn = _pick_tile(n, 512, 128)     # full Cout (64..512) -> 256-aligned on deep layers
    tk = _pick_tile(k, 2048, 128)    # full K where it fits; at most 2 K-steps
    assert m % tm == 0 and n % tn == 0 and k % tk == 0

    a = a.astype(jnp.bfloat16)
    b = b.astype(jnp.bfloat16)

    kernel = functools.partial(_matmul_kernel,
                               apply_lrelu=apply_lrelu, neg_slope=neg_slope)
    cost = pl.CostEstimate(
        flops=2 * m * n * k,
        transcendentals=0,
        bytes_accessed=(m * k + k * n) * 2 + m * n * jnp.dtype(out_dtype).itemsize)
    return pl.pallas_call(
        kernel,
        out_shape=jax.ShapeDtypeStruct((m, n), out_dtype),
        grid_spec=pltpu.PrefetchScalarGridSpec(
            num_scalar_prefetch=0,
            grid=(m // tm, n // tn, k // tk),
            in_specs=[pl.BlockSpec((tm, tk), lambda i, j, kk: (i, kk)),
                      pl.BlockSpec((tk, tn), lambda i, j, kk: (kk, j))],
            out_specs=pl.BlockSpec((tm, tn), lambda i, j, kk: (i, j)),
            scratch_shapes=[pltpu.VMEM((tm, tn), jnp.float32)]),
        compiler_params=pltpu.CompilerParams(
            dimension_semantics=("parallel", "parallel", "arbitrary")),
        cost_estimate=cost,
    )(a, b)


def pallas_bn_lrelu(y, gamma, beta, *, eps=_BN_EPS, neg_slope=_NEG_SLOPE,
                    out_dtype=jnp.bfloat16):
    """Training-mode BatchNorm (batch stats over rows, biased var) + LeakyReLU(0.2).
    y: [M, C] with C a multiple of 128; gamma/beta: [1, C] fp32."""
    m, c = y.shape
    bm = _pick_tile(m, 256, 8)
    assert m % bm == 0

    # Pass 1: per-channel sum / sum-of-squares, tiled over M (accumulate in fp32).
    sums, sqs = pl.pallas_call(
        _bn_stats_kernel,
        out_shape=(jax.ShapeDtypeStruct((1, c), jnp.float32),
                   jax.ShapeDtypeStruct((1, c), jnp.float32)),
        grid=(m // bm,),
        in_specs=[pl.BlockSpec((bm, c), lambda i: (i, 0))],
        out_specs=(pl.BlockSpec((1, c), lambda i: (0, 0)),
                   pl.BlockSpec((1, c), lambda i: (0, 0))),
        compiler_params=pltpu.CompilerParams(
            dimension_semantics=("arbitrary",)),
    )(y)

    # Tiny [1, C] finalize in plain JAX: fold mean/var/gamma/beta into scale/shift.
    mean = sums / m
    var = sqs / m - mean * mean                 # biased variance (PyTorch training mode)
    scale = gamma * jax.lax.rsqrt(var + eps)
    shift = beta - mean * scale

    # Pass 2: normalize + LeakyReLU, tiled over M ("parallel" -> megacore on v7x).
    kernel = functools.partial(_bn_apply_kernel, neg_slope=neg_slope)
    return pl.pallas_call(
        kernel,
        out_shape=jax.ShapeDtypeStruct((m, c), out_dtype),
        grid=(m // bm,),
        in_specs=[pl.BlockSpec((bm, c), lambda i: (i, 0)),
                  pl.BlockSpec((1, c), lambda i: (0, 0)),
                  pl.BlockSpec((1, c), lambda i: (0, 0))],
        out_specs=pl.BlockSpec((bm, c), lambda i: (i, 0)),
        compiler_params=pltpu.CompilerParams(
            dimension_semantics=("parallel",)),
    )(y, scale, shift)


def pallas_final_dot(a, w_col):
    """[M, K] @ [K, 1] as a single-block VPU mul+reduce (avoids 128x-padded MXU work)."""
    m, k = a.shape
    a = a.astype(jnp.bfloat16)
    w_row = w_col.reshape(1, k).astype(jnp.bfloat16)
    return pl.pallas_call(
        _final_dot_kernel,
        out_shape=jax.ShapeDtypeStruct((m, 1), jnp.float32),
        grid=(1,),
        in_specs=[pl.BlockSpec((m, k), lambda i: (0, 0)),
                  pl.BlockSpec((1, k), lambda i: (0, 0))],
        out_specs=pl.BlockSpec((m, 1), lambda i: (0, 0)),
    )(a, w_row)


def _extract_patches(x_nhwc, kh, kw, stride, pad):
    """im2col: [N,H,W,C] -> [N*OH*OW, KH*KW*C] in bf16 (plain-JAX glue)."""
    # TODO(synk): fuse patch extraction into the matmul kernel (manual strided DMA from
    # HBM with memory_space=pl.ANY) to avoid materializing the KH*KW-wide slab in HBM.
    n, h, w, c = x_nhwc.shape
    xp = jnp.pad(x_nhwc, ((0, 0), (pad, pad), (pad, pad), (0, 0)))
    oh = (h + 2 * pad - kh) // stride + 1
    ow = (w + 2 * pad - kw) // stride + 1
    cols = []
    for i in range(kh):
        for j in range(kw):
            cols.append(xp[:, i:i + stride * (oh - 1) + 1:stride,
                           j:j + stride * (ow - 1) + 1:stride, :])
    p = jnp.stack(cols, axis=3)                       # [N, OH, OW, KH*KW, C]
    return p.reshape(n * oh * ow, kh * kw * c), (n, oh, ow)


def conv2d_pallas(x_nhwc, w_hwio, stride, pad, apply_lrelu):
    """Conv2d (no bias) via im2col + Pallas matmul.  w_hwio: [KH,KW,Cin,Cout]."""
    kh, kw, cin, cout = w_hwio.shape
    patches, (n, oh, ow) = _extract_patches(x_nhwc, kh, kw, stride, pad)
    w_mat = w_hwio.reshape(kh * kw * cin, cout)
    y = pallas_matmul(patches, w_mat, apply_lrelu)
    return y.reshape(n, oh, ow, cout)


# ----------------------------------------------------------------------------
# Model: parameters + forward
# ----------------------------------------------------------------------------
def init_params(key):
    shapes = [  # (KH, KW, Cin, Cout) — matches the nn.Conv2d(.., 4, ..) layers
        (4, 4, 3, NDF),
        (4, 4, NDF, NDF * 2),
        (4, 4, NDF * 2, NDF * 4),
        (4, 4, NDF * 4, NDF * 8),
        (4, 4, NDF * 8, 1),
    ]
    keys = jax.random.split(key, len(shapes))
    weights = [0.02 * jax.random.normal(k, s, dtype=jnp.float32)
               for k, s in zip(keys, shapes)]
    # BatchNorm2d default init: weight (gamma) = 1, bias (beta) = 0
    bn_params = [(jnp.ones((1, c), jnp.float32), jnp.zeros((1, c), jnp.float32))
                 for c in (NDF * 2, NDF * 4, NDF * 8)]
    return weights, bn_params


def cov_discriminator_forward(x_nchw, weights, bn_params):
    """Forward pass of CovDiscriminator.  x_nchw: [N, 3, 64, 64] -> [N, 1] logits."""
    # NCHW -> NHWC; activations kept in bf16 between kernels (fp32 math inside).
    x = jnp.transpose(x_nchw, (0, 2, 3, 1)).astype(jnp.bfloat16)

    # Conv(3->64, s2, p1) + LeakyReLU(0.2)  (LeakyReLU fused in the matmul epilogue)
    x = conv2d_pallas(x, weights[0], stride=2, pad=1, apply_lrelu=True)

    # 3 x (Conv + BatchNorm + LeakyReLU)
    for li in range(3):
        x = conv2d_pallas(x, weights[li + 1], stride=2, pad=1, apply_lrelu=False)
        n, oh, ow, c = x.shape
        gamma, beta = bn_params[li]
        x = pallas_bn_lrelu(x.reshape(n * oh * ow, c), gamma, beta)
        x = x.reshape(n, oh, ow, c)

    # Final Conv(512->1, k4, s1, p0): [N,4,4,512] -> patches [N, 8192] -> [N, 1]
    kh, kw, cin, cout = weights[4].shape
    patches, _ = _extract_patches(x, kh, kw, 1, 0)
    logits = pallas_final_dot(patches, weights[4].reshape(kh * kw * cin, cout))
    return logits.reshape(-1, 1)                                   # .view(-1, 1)


if __name__ == "__main__":
    key = jax.random.PRNGKey(0)
    k_param, k_in = jax.random.split(key)

    weights, bn_params = init_params(k_param)
    # DCGAN discriminator architecture requires 64x64 spatial input.
    x = jax.random.normal(k_in, (2, 3, 64, 64), dtype=jnp.float32)

    out = cov_discriminator_forward(x, weights, bn_params)
    out = jax.block_until_ready(out)
    assert out.shape == (2, 1), out.shape
    print("KERNEL_OK")
</pallas_src>

<mosaic_0001>
module attributes {stable_mosaic.version = 11 : i64} {
  func.func @_matmul_kernel(%arg0: i32, %arg1: i32, %arg2: i32, %arg3: memref<256x48xbf16, #tpu.memory_space<vmem>>, %arg4: memref<48x64xbf16, #tpu.memory_space<vmem>>, %arg5: memref<256x64xbf16, #tpu.memory_space<vmem>>, %arg6: memref<256x64xf32, #tpu.memory_space<vmem>>) attributes {dimension_semantics = [#tpu.dimension_semantics<parallel>, #tpu.dimension_semantics<parallel>, #tpu.dimension_semantics<arbitrary>], iteration_bounds = array<i64: 8, 1, 1>, scalar_prefetch = 0 : i64, scratch_operands = 1 : i64, tpu.core_type = #tpu.core_type<tc>, window_params = [{transform_indices = @transform_0, window_bounds = array<i64: 256, 48>}, {transform_indices = @transform_1, window_bounds = array<i64: 48, 64>}, {transform_indices = @transform_2, window_bounds = array<i64: 256, 64>}]} {
    %c0_i32 = arith.constant 0 : i32
    %0 = arith.cmpi eq, %arg2, %c0_i32 : i32
    %1 = arith.extui %0 : i1 to i32
    %c0_i32_0 = arith.constant 0 : i32
    %2 = arith.cmpi ne, %1, %c0_i32_0 : i32
    scf.if %2 {
      %cst_10 = arith.constant 0.000000e+00 : f32
      %12 = vector.broadcast %cst_10 : f32 to vector<256x64xf32>
      %c0_11 = arith.constant 0 : index
      %c0_12 = arith.constant 0 : index
      %13 = vector.load %arg6[%c0_11, %c0_12] : memref<256x64xf32, #tpu.memory_space<vmem>>, vector<256x64xf32>
      tpu.vector_store %arg6[%c0_11, %c0_12], %12 {strides = array<i32>} : memref<256x64xf32, #tpu.memory_space<vmem>>, vector<256x64xf32>,
    } else {
    }
    %c0 = arith.constant 0 : index
    %c0_1 = arith.constant 0 : index
    %3 = vector.load %arg6[%c0, %c0_1] : memref<256x64xf32, #tpu.memory_space<vmem>>, vector<256x64xf32>
    %c0_2 = arith.constant 0 : index
    %c0_3 = arith.constant 0 : index
    %4 = vector.load %arg3[%c0_2, %c0_3] : memref<256x48xbf16, #tpu.memory_space<vmem>>, vector<256x48xbf16>
    %c0_4 = arith.constant 0 : index
    %c0_5 = arith.constant 0 : index
    %5 = vector.load %arg4[%c0_4, %c0_5] : memref<48x64xbf16, #tpu.memory_space<vmem>>, vector<48x64xbf16>
    %cst = arith.constant dense<0.000000e+00> : vector<256x64xf32>
    %6 = tpu.matmul %4, %5, %cst {dimension_numbers = #tpu.dot_dimension_numbers<[1], [0], [0], [1], [0, 0, 1, 1], [], []>} : vector<256x48xbf16>, vector<48x64xbf16>, vector<256x64xf32> -> vector<256x64xf32>
    %7 = arith.addf %3, %6 : vector<256x64xf32>
    %c0_6 = arith.constant 0 : index
    %c0_7 = arith.constant 0 : index
    %8 = vector.load %arg6[%c0_6, %c0_7] : memref<256x64xf32, #tpu.memory_space<vmem>>, vector<256x64xf32>
    tpu.vector_store %arg6[%c0_6, %c0_7], %7 {strides = array<i32>} : memref<256x64xf32, #tpu.memory_space<vmem>>, vector<256x64xf32>,
    %c0_i32_8 = arith.constant 0 : i32
    %9 = arith.cmpi eq, %arg2, %c0_i32_8 : i32
    %10 = arith.extui %9 : i1 to i32
    %c0_i32_9 = arith.constant 0 : i32
    %11 = arith.cmpi ne, %10, %c0_i32_9 : i32
    scf.if %11 {
      %c0_10 = arith.constant 0 : index
      %c0_11 = arith.constant 0 : index
      %12 = vector.load %arg6[%c0_10, %c0_11] : memref<256x64xf32, #tpu.memory_space<vmem>>, vector<256x64xf32>
      %cst_12 = arith.constant 0.000000e+00 : f32
      %13 = vector.broadcast %cst_12 : f32 to vector<256x64xf32>
      %14 = arith.cmpf oge, %12, %13 : vector<256x64xf32>
      %cst_13 = arith.constant 2.000000e-01 : f32
      %15 = vector.broadcast %cst_13 : f32 to vector<256x64xf32>
      %16 = arith.mulf %15, %12 : vector<256x64xf32>
      %17 = arith.select %14, %12, %16 : vector<256x64xi1>, vector<256x64xf32>
      %18 = arith.truncf %17 : vector<256x64xf32> to vector<256x64xbf16>
      %c0_14 = arith.constant 0 : index
      %c0_15 = arith.constant 0 : index
      %19 = vector.load %arg5[%c0_14, %c0_15] : memref<256x64xbf16, #tpu.memory_space<vmem>>, vector<256x64xbf16>
      tpu.vector_store %arg5[%c0_14, %c0_15], %18 {strides = array<i32>} : memref<256x64xbf16, #tpu.memory_space<vmem>>, vector<256x64xbf16>,
    } else {
    }
    return
  }
  func.func @transform_0(%arg0: i32, %arg1: i32, %arg2: i32) -> (i32, i32) {
    %c0_i32 = arith.constant 0 : i32
    return %arg0, %arg2 : i32, i32
  }
  func.func @transform_1(%arg0: i32, %arg1: i32, %arg2: i32) -> (i32, i32) {
    %c0_i32 = arith.constant 0 : i32
    return %arg2, %arg1 : i32, i32
  }
  func.func @transform_2(%arg0: i32, %arg1: i32, %arg2: i32) -> (i32, i32) {
    %c0_i32 = arith.constant 0 : i32
    return %arg0, %arg1 : i32, i32
  }
}

</mosaic_0001>

<bundles_post_ra>
// kernel: tpu_custom_call.1
= control target key start
LH: loop header
LB: loop body
LE: loop exit
PB: predicated region body
PF: predicated region fallthrough
CT: control target
= control target key end

     0   :  { %s1119_s9 = smov 0   ;;  %s1121_s10 = smov 0   ;;  %s1332_s0 = inlined_call_operand.vmem [shape: bf16[2048,48], index: 0, kind: input, shape index: {}]   ;;  %s1333_s1 = inlined_call_operand.vmem [shape: bf16[48,64], index: 1, kind: input, shape index: {}]   ;;  %s1334_s2 = inlined_call_operand.vmem [shape: bf16[2048,64], index: 2, kind: output, shape index: {}]  }
   0x1   :  { %s1123_s11 = smov 0  }
   0x2 LB: > { %s31_s12 = sadd.s32 1, %s1097_s10  ;;  %p927_p0 = scmp.ge.s32.totalorder %s1101_s11, 1  ;;  %s1101_s11 = sphi %s1123_s11, %s12_s11   ;;  %s1097_s10 = sphi %s1121_s10, %s1336_s10   ;;  %s1093_s9 = sphi %s1119_s9, %s1335_s9  }
   0x3   : > { %p33_p1 = scmp.ge.s32.totalorder %s31_s12, 8  ;;  %p155_p2 = scmp.lt.s32.totalorder %s1101_s11, 9 }
   0x5   : > { %s1338_s12 = smov (%p33_p1, %s31_s12), 0  ;;  %p156_p3 = pnand %p927_p0, %p155_p2 }
   0x6   : > { %s928_s15 = sshll.u32 (!%p156_p3), %s1093_s9, 5 }
   0x7   : > { %159 = sbr.rel (%p156_p3) target bundleno = 233 (0xe9), region = 28  ;;  %p192_p4 = scmp.lt.s32.totalorder (!%p156_p3), %s928_s15, 255 }
   0xc   : > { %v1044_v0 = vld [vmem:[%s1333_s1 + $0x10] sm:$0xff]  ;;  %v1043_v1 = vld [vmem:[%s1333_s1 + $0x8] sm:$0xff]  ;;  %s1340_s15 = smov (!%p192_p4, %s928_s15), 255  ;;  %v1042_v2 = vld [vmem:[%s1333_s1] sm:$0xff]  ;;  %vm424_vm0 = vcmask 392192   ;;  %vm223_vm1 = vcmask 523264  }
   0xd   : > { %478 = vmatpush.bf16.msra.mxu0 %v1044_v0  ;;  %1045 = vmatpush.bf16.msra.mxu1 %v1044_v0  ;;  %s929_s18 = sshll.u32 %s1340_s15, 2  ;;  %v1103_v11 = vmov 0.0   ;;  %vm790_vm4 = vcmask 519168  }
   0xe   : > { %1046 = vmatpush.bf16.msra.mxu2 %v1044_v0  ;;  %1047 = vmatpush.bf16.msra.mxu3 %v1044_v0  ;;  %s1154_s23 = scalar_lea.vmem %s1332_s0, %s929_s18  ;;  %224 = vst.msk [vmem:[#allocation2] sm:$0xff] %vm223_vm1, %v1103_v11  ;;  %s1230_s26 = scalar_lea.vmem %s1334_s2, %s929_s18 }
   0xf   : > { %v1026_v3 = vld [vmem:[%s1154_s23] sm:$0xff]  ;;  %v1027_v7 = vld [vmem:[%s1154_s23 + $0x8] sm:$0xff]  ;;  %225 = vst.msk [vmem:[#allocation2 + $0x8] sm:$0xff] %vm223_vm1, %v1103_v11  ;;  %v1028_v12 = vld [vmem:[%s1154_s23 + $0x10] sm:$0xff] }
  0x10   : > { %v1030_v4 = vld [vmem:[%s1154_s23 + $0x20] sm:$0xff]  ;;  %v1031_v8 = vld [vmem:[%s1154_s23 + $0x28] sm:$0xff]  ;;  %226 = vst.msk [vmem:[#allocation2 + $0x10] sm:$0xff] %vm223_vm1, %v1103_v11  ;;  %v1032_v13 = vld [vmem:[%s1154_s23 + $0x30] sm:$0xff] }
  0x11   : > { %479 = vmatpush.bf16.msra.mxu0 %v1043_v1  ;;  %1048 = vmatpush.bf16.msra.mxu1 %v1043_v1  ;;  %v1034_v5 = vld [vmem:[%s1154_s23 + $0x40] sm:$0xff]  ;;  %v1035_v9 = vld [vmem:[%s1154_s23 + $0x48] sm:$0xff]  ;;  %227 = vst.msk [vmem:[#allocation2 + $0x18] sm:$0xff] %vm223_vm1, %v1103_v11  ;;  %v1036_v14 = vld [vmem:[%s1154_s23 + $0x50] sm:$0xff] }
  0x12   : > { %1049 = vmatpush.bf16.msra.mxu2 %v1043_v1  ;;  %1050 = vmatpush.bf16.msra.mxu3 %v1043_v1  ;;  %v1038_v6 = vld [vmem:[%s1154_s23 + $0x60] sm:$0xff]  ;;  %v1039_v10 = vld [vmem:[%s1154_s23 + $0x68] sm:$0xff]  ;;  %228 = vst.msk [vmem:[#allocation2 + $0x20] sm:$0xff] %vm223_vm1, %v1103_v11  ;;  %v1040_v15 = vld [vmem:[%s1154_s23 + $0x70] sm:$0xff] }
  0x13   : > { %229 = vst.msk [vmem:[#allocation2 + $0x28] sm:$0xff] %vm223_vm1, %v1103_v11  ;;  %v1029_v16 = vld [vmem:[%s1154_s23 + $0x18] sm:$0xff] }
  0x14   : > { %230 = vst.msk [vmem:[#allocation2 + $0x30] sm:$0xff] %vm223_vm1, %v1103_v11  ;;  %v1033_v17 = vld [vmem:[%s1154_s23 + $0x38] sm:$0xff] }
  0x15   : > { %480 = vmatpush.bf16.msra.mxu0 %v1042_v2  ;;  %1051 = vmatpush.bf16.msra.mxu1 %v1042_v2  ;;  %231 = vst.msk [vmem:[#allocation2 + $0x38] sm:$0xff] %vm223_vm1, %v1103_v11  ;;  %v1037_v18 = vld [vmem:[%s1154_s23 + $0x58] sm:$0xff]  ;;  %v256_v20 = vld [vmem:[#allocation2] sm:$0xff] }
  0x16   : > { %1052 = vmatpush.bf16.msra.mxu2 %v1042_v2  ;;  %1053 = vmatpush.bf16.msra.mxu3 %v1042_v2  ;;  %232 = vst.msk [vmem:[#allocation2 + $0x40] sm:$0xff] %vm223_vm1, %v1103_v11  ;;  %v1041_v19 = vld [vmem:[%s1154_s23 + $0x78] sm:$0xff]  ;;  %v257_v28 = vld [vmem:[#allocation2 + $0x8] sm:$0xff] }
  0x17   : > { %233 = vst.msk [vmem:[#allocation2 + $0x48] sm:$0xff] %vm223_vm1, %v1103_v11  ;;  %v258_v47 = vld [vmem:[#allocation2 + $0x10] sm:$0xff] }
  0x18   : > { %1008 = vmatmul.msk.bf16.vlgmr.msra.gmra.mxu0 %vm424_vm0, %v1026_v3  ;;  %1012 = vmatmul.msk.bf16.vlgmr.msra.gmra.mxu1 %vm424_vm0, %v1030_v4  ;;  %234 = vst.msk [vmem:[#allocation2 + $0x50] sm:$0xff] %vm223_vm1, %v1103_v11 }
  0x19   : > { %1016 = vmatmul.msk.bf16.vlgmr.msra.gmra.mxu2 %vm424_vm0, %v1034_v5  ;;  %1020 = vmatmul.msk.bf16.vlgmr.msra.gmra.mxu3 %vm424_vm0, %v1038_v6  ;;  %235 = vst.msk [vmem:[#allocation2 + $0x58] sm:$0xff] %vm223_vm1, %v1103_v11 }
  0x1a   : > { %236 = vst.msk [vmem:[#allocation2 + $0x60] sm:$0xff] %vm223_vm1, %v1103_v11 }
  0x1b   : > { %237 = vst.msk [vmem:[#allocation2 + $0x68] sm:$0xff] %vm223_vm1, %v1103_v11 }
  0x1c   : > { %238 = vst.msk [vmem:[#allocation2 + $0x70] sm:$0xff] %vm223_vm1, %v1103_v11 }
  0x1d   : > { %239 = vst.msk [vmem:[#allocation2 + $0x78] sm:$0xff] %vm223_vm1, %v1103_v11  ;;  %v264_v21 = vld [vmem:[#allocation2 + $0x40] sm:$0xff] }
  0x1e   : > { %240 = vst.msk [vmem:[#allocation2 + $0x80] sm:$0xff] %vm223_vm1, %v1103_v11  ;;  %v265_v29 = vld [vmem:[#allocation2 + $0x48] sm:$0xff] }
  0x1f   : > { %241 = vst.msk [vmem:[#allocation2 + $0x88] sm:$0xff] %vm223_vm1, %v1103_v11  ;;  %v266_v48 = vld [vmem:[#allocation2 + $0x50] sm:$0xff] }
  0x20   : > { %242 = vst.msk [vmem:[#allocation2 + $0x90] sm:$0xff] %vm223_vm1, %v1103_v11 }
  0x21   : > { %243 = vst.msk [vmem:[#allocation2 + $0x98] sm:$0xff] %vm223_vm1, %v1103_v11 }
  0x22   : > { %244 = vst.msk [vmem:[#allocation2 + $0xa0] sm:$0xff] %vm223_vm1, %v1103_v11 }
  0x23   : > { %245 = vst.msk [vmem:[#allocation2 + $0xa8] sm:$0xff] %vm223_vm1, %v1103_v11 }
  0x24   : > { %246 = vst.msk [vmem:[#allocation2 + $0xb0] sm:$0xff] %vm223_vm1, %v1103_v11 }
  0x25   : > { %247 = vst.msk [vmem:[#allocation2 + $0xb8] sm:$0xff] %vm223_vm1, %v1103_v11  ;;  %v272_v26 = vld [vmem:[#allocation2 + $0x80] sm:$0xff] }
  0x26   : > { %248 = vst.msk [vmem:[#allocation2 + $0xc0] sm:$0xff] %vm223_vm1, %v1103_v11  ;;  %v273_v43 = vld [vmem:[#allocation2 + $0x88] sm:$0xff] }
  0x27   : > { %249 = vst.msk [vmem:[#allocation2 + $0xc8] sm:$0xff] %vm223_vm1, %v1103_v11  ;;  %v274_v5 = vld [vmem:[#allocation2 + $0x90] sm:$0xff] }
  0x28   : > { %1009 = vmatmul.msk.bf16.gmra.mxu0 %vm424_vm0, %v1027_v7  ;;  %1013 = vmatmul.msk.bf16.gmra.mxu1 %vm424_vm0, %v1031_v8  ;;  %250 = vst.msk [vmem:[#allocation2 + $0xd0] sm:$0xff] %vm223_vm1, %v1103_v11 }
  0x29   : > { %1017 = vmatmul.msk.bf16.gmra.mxu2 %vm424_vm0, %v1035_v9  ;;  %1021 = vmatmul.msk.bf16.gmra.mxu3 %vm424_vm0, %v1039_v10  ;;  %251 = vst.msk [vmem:[#allocation2 + $0xd8] sm:$0xff] %vm223_vm1, %v1103_v11  ;;  %v259_v9 = vld [vmem:[#allocation2 + $0x18] sm:$0xff] }
  0x2a   : > { %252 = vst.msk [vmem:[#allocation2 + $0xe0] sm:$0xff] %vm223_vm1, %v1103_v11 }
  0x2b   : > { %253 = vst.msk [vmem:[#allocation2 + $0xe8] sm:$0xff] %vm223_vm1, %v1103_v11 }
  0x2c   : > { %254 = vst.msk [vmem:[#allocation2 + $0xf0] sm:$0xff] %vm223_vm1, %v1103_v11 }
  0x2d   : > { %255 = vst.msk [vmem:[#allocation2 + $0xf8] sm:$0xff] %vm223_vm1, %v1103_v11  ;;  %v280_v27 = vld [vmem:[#allocation2 + $0xc0] sm:$0xff] }
  0x2e   : > { %v281_v44 = vld [vmem:[#allocation2 + $0xc8] sm:$0xff] }
  0x2f   : > { %v282_v6 = vld [vmem:[#allocation2 + $0xd0] sm:$0xff] }
  0x38   : > { %1010 = vmatmul.msk.bf16.gmra.mxu0 %vm424_vm0, %v1028_v12  ;;  %1014 = vmatmul.msk.bf16.gmra.mxu1 %vm424_vm0, %v1032_v13 }
  0x39   : > { %1018 = vmatmul.msk.bf16.gmra.mxu2 %vm424_vm0, %v1036_v14  ;;  %1022 = vmatmul.msk.bf16.gmra.mxu3 %vm424_vm0, %v1040_v15  ;;  %v267_v14 = vld [vmem:[#allocation2 + $0x58] sm:$0xff] }
  0x48   : > { %1011 = vmatmul.msk.bf16.gmra.mxu0 %vm424_vm0, %v1029_v16  ;;  %1015 = vmatmul.msk.bf16.gmra.mxu1 %vm424_vm0, %v1033_v17 }
  0x49   : > { %1019 = vmatmul.msk.bf16.gmra.mxu2 %vm424_vm0, %v1037_v18  ;;  %1023 = vmatmul.msk.bf16.gmra.mxu3 %vm424_vm0, %v1041_v19 }
  0x95   : > { %v482_v22 = vpop.f32.mrf.mxu0  ;;  %v502_v23 = vpop.f32.mrf.mxu1 }
  0x96   : > { %v562_v24 = vadd.f32 %v482_v22, %v256_v20  ;;  %v570_v25 = vadd.f32 %v502_v23, %v264_v21 }
  0x98   : > { %595 = vst.msk [vmem:[#allocation2] sm:$0xff] %vm223_vm1, %v562_v24 }
  0x99   : > { %603 = vst.msk [vmem:[#allocation2 + $0x40] sm:$0xff] %vm223_vm1, %v570_v25 }
  0x9c   : > { %v522_v30 = vpop.f32.mrf.mxu2  ;;  %v542_v31 = vpop.f32.mrf.mxu3 }
  0x9d   : > { %v578_v32 = vadd.f32 %v522_v30, %v272_v26  ;;  %v586_v33 = vadd.f32 %v542_v31, %v280_v27  ;;  %v484_v34 = vpop.f32.mrf.mxu0  ;;  %v504_v35 = vpop.f32.mrf.mxu1 }
  0x9e   : > { %v563_v36 = vadd.f32 %v484_v34, %v257_v28  ;;  %v571_v37 = vadd.f32 %v504_v35, %v265_v29  ;;  %v283_v34 = vld [vmem:[#allocation2 + $0xd8] sm:$0xff] }
  0x9f   : > { %v630_v38 = vld [vmem:[#allocation2] sm:$0xff]  ;;  %611 = vst.msk [vmem:[#allocation2 + $0x80] sm:$0xff] %vm223_vm1, %v578_v32 }
  0xa0   : > { %vm662_vm2 = vcmp.ge.f32.partialorder %v630_v38, 0.0  ;;  %v694_v39 = vmul.f32 0.2, %v630_v38  ;;  %v638_v40 = vld [vmem:[#allocation2 + $0x40] sm:$0xff]  ;;  %619 = vst.msk [vmem:[#allocation2 + $0xc0] sm:$0xff] %vm223_vm1, %v586_v33  ;;  %v275_v33 = vld [vmem:[#allocation2 + $0x98] sm:$0xff] }
  0xa1   : > { %vm670_vm3 = vcmp.ge.f32.partialorder %v638_v40, 0.0  ;;  %v702_v41 = vmul.f32 0.2, %v638_v40  ;;  %596 = vst.msk [vmem:[#allocation2 + $0x8] sm:$0xff] %vm223_vm1, %v563_v36 }
  0xa2   : > { %v726_v42 = vsel %vm662_vm2, %v630_v38, %v694_v39  ;;  %604 = vst.msk [vmem:[#allocation2 + $0x48] sm:$0xff] %vm223_vm1, %v571_v37  ;;  %v260_v37 = vld [vmem:[#allocation2 + $0x20] sm:$0xff] }
  0xa3   : > { %v758_v45 = vpack.c.bf16 %v726_v42, %v726_v42  ;;  %v734_v46 = vsel %vm670_vm3, %v638_v40, %v702_v41  ;;  %v268_v42 = vld [vmem:[#allocation2 + $0x60] sm:$0xff] }
  0xa4   : > { %v766_v49 = vpack.c.bf16 %v734_v46, %v734_v46  ;;  %v524_v50 = vpop.f32.mrf.mxu2  ;;  %v544_v51 = vpop.f32.mrf.mxu3 }
  0xa5   : > { %791 = vst.msk [vmem:[%s1230_s26] sm:$0xf] %vm790_vm4, %v758_v45  ;;  %v579_v52 = vadd.f32 %v524_v50, %v273_v43  ;;  %v587_v53 = vadd.f32 %v544_v51, %v281_v44  ;;  %v487_v54 = vpop.f32.mrf.mxu0  ;;  %v507_v55 = vpop.f32.mrf.mxu1 }
  0xa6   : > { %799 = vst.msk [vmem:[%s1230_s26 + $0x20] sm:$0xf] %vm790_vm4, %v766_v49  ;;  %v646_v56 = vld [vmem:[#allocation2 + $0x80] sm:$0xff]  ;;  %v564_v57 = vadd.f32 %v487_v54, %v258_v47  ;;  %v572_v58 = vadd.f32 %v507_v55, %v266_v48 }
  0xa7   : > { %vm678_vm5 = vcmp.ge.f32.partialorder %v646_v56, 0.0  ;;  %v710_v59 = vmul.f32 0.2, %v646_v56  ;;  %v654_v60 = vld [vmem:[#allocation2 + $0xc0] sm:$0xff]  ;;  %612 = vst.msk [vmem:[#allocation2 + $0x88] sm:$0xff] %vm223_vm1, %v579_v52 }
  0xa8   : > { %vm686_vm6 = vcmp.ge.f32.partialorder %v654_v60, 0.0  ;;  %v718_v61 = vmul.f32 0.2, %v654_v60  ;;  %v631_v62 = vld [vmem:[#allocation2 + $0x8] sm:$0xff]  ;;  %620 = vst.msk [vmem:[#allocation2 + $0xc8] sm:$0xff] %vm223_vm1, %v587_v53 }
  0xa9   : > { %v742_v63 = vsel %vm678_vm5, %v646_v56, %v710_v59  ;;  %vm663_vm7 = vcmp.ge.f32.partialorder %v631_v62, 0.0  ;;  %v695_v0 = vmul.f32 0.2, %v631_v62  ;;  %v639_v1 = vld [vmem:[#allocation2 + $0x48] sm:$0xff]  ;;  %597 = vst.msk [vmem:[#allocation2 + $0x10] sm:$0xff] %vm223_vm1, %v564_v57 }
  0xaa   : > { %v774_v2 = vpack.c.bf16 %v742_v63, %v742_v63  ;;  %v750_v3 = vsel %vm686_vm6, %v654_v60, %v718_v61  ;;  %vm671_vm8 = vcmp.ge.f32.partialorder %v639_v1, 0.0  ;;  %v703_v4 = vmul.f32 0.2, %v639_v1  ;;  %605 = vst.msk [vmem:[#allocation2 + $0x50] sm:$0xff] %vm223_vm1, %v572_v58  ;;  %v276_v58 = vld [vmem:[#allocation2 + $0xa0] sm:$0xff] }
  0xab   : > { %v782_v7 = vpack.c.bf16 %v750_v3, %v750_v3  ;;  %v727_v8 = vsel %vm663_vm7, %v631_v62, %v695_v0  ;;  %v284_v62 = vld [vmem:[#allocation2 + $0xe0] sm:$0xff]  ;;  %v261_v3 = vld [vmem:[#allocation2 + $0x28] sm:$0xff] }
  0xac   : > { %807 = vst.msk [vmem:[%s1230_s26 + $0x40] sm:$0xf] %vm790_vm4, %v774_v2  ;;  %v759_v10 = vpack.c.bf16 %v727_v8, %v727_v8  ;;  %v735_v11 = vsel %vm671_vm8, %v639_v1, %v703_v4  ;;  %v527_v12 = vpop.f32.mrf.mxu2  ;;  %v547_v13 = vpop.f32.mrf.mxu3  ;;  %v269_v8 = vld [vmem:[#allocation2 + $0x68] sm:$0xff] }
  0xad   : > { %815 = vst.msk [vmem:[%s1230_s26 + $0x60] sm:$0xf] %vm790_vm4, %v782_v7  ;;  %v767_v15 = vpack.c.bf16 %v735_v11, %v735_v11  ;;  %v580_v16 = vadd.f32 %v527_v12, %v274_v5  ;;  %v588_v17 = vadd.f32 %v547_v13, %v282_v6  ;;  %v489_v18 = vpop.f32.mrf.mxu0  ;;  %v509_v19 = vpop.f32.mrf.mxu1 }
  0xae   : > { %792 = vst.msk [vmem:[%s1230_s26 + $0x4] sm:$0xf] %vm790_vm4, %v759_v10  ;;  %v647_v20 = vld [vmem:[#allocation2 + $0x88] sm:$0xff]  ;;  %v565_v21 = vadd.f32 %v489_v18, %v259_v9  ;;  %v573_v24 = vadd.f32 %v509_v19, %v267_v14 }
  0xaf   : > { %800 = vst.msk [vmem:[%s1230_s26 + $0x24] sm:$0xf] %vm790_vm4, %v767_v15  ;;  %vm679_vm9 = vcmp.ge.f32.partialorder %v647_v20, 0.0  ;;  %v711_v22 = vmul.f32 0.2, %v647_v20  ;;  %v655_v23 = vld [vmem:[#allocation2 + $0xc8] sm:$0xff] }
  0xb0   : > { %vm687_vm10 = vcmp.ge.f32.partialorder %v655_v23, 0.0  ;;  %v719_v25 = vmul.f32 0.2, %v655_v23  ;;  %v632_v26 = vld [vmem:[#allocation2 + $0x10] sm:$0xff]  ;;  %613 = vst.msk [vmem:[#allocation2 + $0x90] sm:$0xff] %vm223_vm1, %v580_v16 }
  0xb1   : > { %v743_v27 = vsel %vm679_vm9, %v647_v20, %v711_v22  ;;  %vm664_vm11 = vcmp.ge.f32.partialorder %v632_v26, 0.0  ;;  %v696_v28 = vmul.f32 0.2, %v632_v26  ;;  %v640_v29 = vld [vmem:[#allocation2 + $0x50] sm:$0xff]  ;;  %621 = vst.msk [vmem:[#allocation2 + $0xd0] sm:$0xff] %vm223_vm1, %v588_v17  ;;  %v277_v22 = vld [vmem:[#allocation2 + $0xa8] sm:$0xff] }
  0xb2   : > { %v775_v30 = vpack.c.bf16 %v743_v27, %v743_v27  ;;  %v751_v31 = vsel %vm687_vm10, %v655_v23, %v719_v25  ;;  %vm672_vm12 = vcmp.ge.f32.partialorder %v640_v29, 0.0  ;;  %v704_v32 = vmul.f32 0.2, %v640_v29  ;;  %598 = vst.msk [vmem:[#allocation2 + $0x18] sm:$0xff] %vm223_vm1, %v565_v21 }
  0xb3   : > { %v783_v35 = vpack.c.bf16 %v751_v31, %v751_v31  ;;  %v728_v36 = vsel %vm664_vm11, %v632_v26, %v696_v28  ;;  %606 = vst.msk [vmem:[#allocation2 + $0x58] sm:$0xff] %vm223_vm1, %v573_v24  ;;  %v285_v26 = vld [vmem:[#allocation2 + $0xe8] sm:$0xff]  ;;  %v262_v31 = vld [vmem:[#allocation2 + $0x30] sm:$0xff] }
  0xb4   : > { %808 = vst.msk [vmem:[%s1230_s26 + $0x44] sm:$0xf] %vm790_vm4, %v775_v30  ;;  %v760_v38 = vpack.c.bf16 %v728_v36, %v728_v36  ;;  %v736_v39 = vsel %vm672_vm12, %v640_v29, %v704_v32  ;;  %v529_v40 = vpop.f32.mrf.mxu2  ;;  %v549_v41 = vpop.f32.mrf.mxu3  ;;  %v270_v36 = vld [vmem:[#allocation2 + $0x70] sm:$0xff] }
  0xb5   : > { %816 = vst.msk [vmem:[%s1230_s26 + $0x64] sm:$0xf] %vm790_vm4, %v783_v35  ;;  %v768_v43 = vpack.c.bf16 %v736_v39, %v736_v39  ;;  %v581_v44 = vadd.f32 %v529_v40, %v275_v33  ;;  %v589_v45 = vadd.f32 %v549_v41, %v283_v34  ;;  %v492_v46 = vpop.f32.mrf.mxu0  ;;  %v512_v47 = vpop.f32.mrf.mxu1 }
  0xb6   : > { %793 = vst.msk [vmem:[%s1230_s26 + $0x8] sm:$0xf] %vm790_vm4, %v760_v38  ;;  %v566_v48 = vadd.f32 %v492_v46, %v260_v37  ;;  %v574_v50 = vadd.f32 %v512_v47, %v268_v42 }
  0xb7   : > { %801 = vst.msk [vmem:[%s1230_s26 + $0x28] sm:$0xf] %vm790_vm4, %v768_v43  ;;  %v648_v49 = vld [vmem:[#allocation2 + $0x90] sm:$0xff] }
  0xb8   : > { %vm680_vm13 = vcmp.ge.f32.partialorder %v648_v49, 0.0  ;;  %v712_v51 = vmul.f32 0.2, %v648_v49  ;;  %v656_v52 = vld [vmem:[#allocation2 + $0xd0] sm:$0xff]  ;;  %614 = vst.msk [vmem:[#allocation2 + $0x98] sm:$0xff] %vm223_vm1, %v581_v44 }
  0xb9   : > { %vm688_vm14 = vcmp.ge.f32.partialorder %v656_v52, 0.0  ;;  %v720_v53 = vmul.f32 0.2, %v656_v52  ;;  %v633_v54 = vld [vmem:[#allocation2 + $0x18] sm:$0xff]  ;;  %622 = vst.msk [vmem:[#allocation2 + $0xd8] sm:$0xff] %vm223_vm1, %v589_v45 }
  0xba   : > { %v744_v55 = vsel %vm680_vm13, %v648_v49, %v712_v51  ;;  %vm665_vm15 = vcmp.ge.f32.partialorder %v633_v54, 0.0  ;;  %v697_v56 = vmul.f32 0.2, %v633_v54  ;;  %v641_v57 = vld [vmem:[#allocation2 + $0x58] sm:$0xff]  ;;  %599 = vst.msk [vmem:[#allocation2 + $0x20] sm:$0xff] %vm223_vm1, %v566_v48 }
  0xbb   : > { %v776_v59 = vpack.c.bf16 %v744_v55, %v744_v55  ;;  %v752_v60 = vsel %vm688_vm14, %v656_v52, %v720_v53  ;;  %vm673_vm0 = vcmp.ge.f32.partialorder %v641_v57, 0.0  ;;  %v705_v61 = vmul.f32 0.2, %v641_v57  ;;  %607 = vst.msk [vmem:[#allocation2 + $0x60] sm:$0xff] %vm223_vm1, %v574_v50  ;;  %v278_v50 = vld [vmem:[#allocation2 + $0xb0] sm:$0xff] }
  0xbc   : > { %v784_v63 = vpack.c.bf16 %v752_v60, %v752_v60  ;;  %v729_v0 = vsel %vm665_vm15, %v633_v54, %v697_v56  ;;  %v532_v1 = vpop.f32.mrf.mxu2  ;;  %v552_v2 = vpop.f32.mrf.mxu3  ;;  %v286_v55 = vld [vmem:[#allocation2 + $0xf0] sm:$0xff] }
  0xbd   : > { %809 = vst.msk [vmem:[%s1230_s26 + $0x48] sm:$0xf] %vm790_vm4, %v776_v59  ;;  %v761_v4 = vpack.c.bf16 %v729_v0, %v729_v0  ;;  %v737_v5 = vsel %vm673_vm0, %v641_v57, %v705_v61  ;;  %v582_v6 = vadd.f32 %v532_v1, %v276_v58  ;;  %v494_v7 = vpop.f32.mrf.mxu0  ;;  %v514_v9 = vpop.f32.mrf.mxu1  ;;  %v590_v11 = vadd.f32 %v552_v2, %v284_v62  ;;  %v263_v59 = vld [vmem:[#allocation2 + $0x38] sm:$0xff] }
  0xbe   : > { %817 = vst.msk [vmem:[%s1230_s26 + $0x68] sm:$0xf] %vm790_vm4, %v784_v63  ;;  %v769_v10 = vpack.c.bf16 %v737_v5, %v737_v5  ;;  %v567_v13 = vadd.f32 %v494_v7, %v261_v3  ;;  %v575_v16 = vadd.f32 %v514_v9, %v269_v8  ;;  %v271_v0 = vld [vmem:[#allocation2 + $0x78] sm:$0xff] }
  0xbf   : > { %794 = vst.msk [vmem:[%s1230_s26 + $0xc] sm:$0xf] %vm790_vm4, %v761_v4  ;;  %v649_v12 = vld [vmem:[#allocation2 + $0x98] sm:$0xff] }
  0xc0   : > { %802 = vst.msk [vmem:[%s1230_s26 + $0x2c] sm:$0xf] %vm790_vm4, %v769_v10  ;;  %vm681_vm2 = vcmp.ge.f32.partialorder %v649_v12, 0.0  ;;  %v713_v14 = vmul.f32 0.2, %v649_v12  ;;  %v657_v15 = vld [vmem:[#allocation2 + $0xd8] sm:$0xff] }
  0xc1   : > { %vm689_vm3 = vcmp.ge.f32.partialorder %v657_v15, 0.0  ;;  %v721_v17 = vmul.f32 0.2, %v657_v15  ;;  %v634_v18 = vld [vmem:[#allocation2 + $0x20] sm:$0xff]  ;;  %615 = vst.msk [vmem:[#allocation2 + $0xa0] sm:$0xff] %vm223_vm1, %v582_v6 }
  0xc2   : > { %v745_v19 = vsel %vm681_vm2, %v649_v12, %v713_v14  ;;  %vm666_vm5 = vcmp.ge.f32.partialorder %v634_v18, 0.0  ;;  %v698_v20 = vmul.f32 0.2, %v634_v18  ;;  %v642_v21 = vld [vmem:[#allocation2 + $0x60] sm:$0xff]  ;;  %623 = vst.msk [vmem:[#allocation2 + $0xe0] sm:$0xff] %vm223_vm1, %v590_v11  ;;  %v279_v14 = vld [vmem:[#allocation2 + $0xb8] sm:$0xff] }
  0xc3   : > { %v777_v23 = vpack.c.bf16 %v745_v19, %v745_v19  ;;  %v753_v24 = vsel %vm689_vm3, %v657_v15, %v721_v17  ;;  %vm674_vm6 = vcmp.ge.f32.partialorder %v642_v21, 0.0  ;;  %v706_v25 = vmul.f32 0.2, %v642_v21  ;;  %600 = vst.msk [vmem:[#allocation2 + $0x28] sm:$0xff] %vm223_vm1, %v567_v13  ;;  %v287_v19 = vld [vmem:[#allocation2 + $0xf8] sm:$0xff] }
  0xc4   : > { %v785_v27 = vpack.c.bf16 %v753_v24, %v753_v24  ;;  %v730_v28 = vsel %vm666_vm5, %v634_v18, %v698_v20  ;;  %608 = vst.msk [vmem:[#allocation2 + $0x68] sm:$0xff] %vm223_vm1, %v575_v16  ;;  %v534_v29 = vpop.f32.mrf.mxu2  ;;  %v554_v30 = vpop.f32.mrf.mxu3 }
  0xc5   : > { %810 = vst.msk [vmem:[%s1230_s26 + $0x4c] sm:$0xf] %vm790_vm4, %v777_v23  ;;  %v762_v32 = vpack.c.bf16 %v730_v28, %v730_v28  ;;  %v738_v33 = vsel %vm674_vm6, %v642_v21, %v706_v25  ;;  %v583_v34 = vadd.f32 %v534_v29, %v277_v22  ;;  %v497_v35 = vpop.f32.mrf.mxu0  ;;  %v517_v37 = vpop.f32.mrf.mxu1  ;;  %v591_v39 = vadd.f32 %v554_v30, %v285_v26 }
  0xc6   : > { %818 = vst.msk [vmem:[%s1230_s26 + $0x6c] sm:$0xf] %vm790_vm4, %v785_v27  ;;  %v770_v38 = vpack.c.bf16 %v738_v33, %v738_v33  ;;  %v568_v40 = vadd.f32 %v497_v35, %v262_v31  ;;  %v576_v42 = vadd.f32 %v517_v37, %v270_v36 }
  0xc7   : > { %795 = vst.msk [vmem:[%s1230_s26 + $0x10] sm:$0xf] %vm790_vm4, %v762_v32 }
  0xc8   : > { %803 = vst.msk [vmem:[%s1230_s26 + $0x30] sm:$0xf] %vm790_vm4, %v770_v38  ;;  %v650_v41 = vld [vmem:[#allocation2 + $0xa0] sm:$0xff] }
  0xc9   : > { %vm682_vm7 = vcmp.ge.f32.partialorder %v650_v41, 0.0  ;;  %v714_v43 = vmul.f32 0.2, %v650_v41  ;;  %v658_v44 = vld [vmem:[#allocation2 + $0xe0] sm:$0xff]  ;;  %616 = vst.msk [vmem:[#allocation2 + $0xa8] sm:$0xff] %vm223_vm1, %v583_v34 }
  0xca   : > { %vm690_vm8 = vcmp.ge.f32.partialorder %v658_v44, 0.0  ;;  %v722_v45 = vmul.f32 0.2, %v658_v44  ;;  %v635_v46 = vld [vmem:[#allocation2 + $0x28] sm:$0xff]  ;;  %624 = vst.msk [vmem:[#allocation2 + $0xe8] sm:$0xff] %vm223_vm1, %v591_v39 }
  0xcb   : > { %v746_v47 = vsel %vm682_vm7, %v650_v41, %v714_v43  ;;  %vm667_vm9 = vcmp.ge.f32.partialorder %v635_v46, 0.0  ;;  %v699_v48 = vmul.f32 0.2, %v635_v46  ;;  %v643_v49 = vld [vmem:[#allocation2 + $0x68] sm:$0xff]  ;;  %601 = vst.msk [vmem:[#allocation2 + $0x30] sm:$0xff] %vm223_vm1, %v568_v40 }
  0xcc   : > { %v778_v51 = vpack.c.bf16 %v746_v47, %v746_v47  ;;  %v754_v52 = vsel %vm690_vm8, %v658_v44, %v722_v45  ;;  %vm675_vm10 = vcmp.ge.f32.partialorder %v643_v49, 0.0  ;;  %v707_v53 = vmul.f32 0.2, %v643_v49  ;;  %609 = vst.msk [vmem:[#allocation2 + $0x70] sm:$0xff] %vm223_vm1, %v576_v42  ;;  %v537_v54 = vpop.f32.mrf.mxu2  ;;  %v557_v56 = vpop.f32.mrf.mxu3 }
  0xcd   : > { %v786_v57 = vpack.c.bf16 %v754_v52, %v754_v52  ;;  %v731_v58 = vsel %vm667_vm9, %v635_v46, %v699_v48  ;;  %v499_v60 = vpop.f32.mrf.mxu0  ;;  %v584_v63 = vadd.f32 %v537_v54, %v278_v50  ;;  %v519_v1 = vpop.f32.mrf.mxu1  ;;  %v592_v3 = vadd.f32 %v557_v56, %v286_v55 }
  0xce   : > { %811 = vst.msk [vmem:[%s1230_s26 + $0x50] sm:$0xf] %vm790_vm4, %v778_v51  ;;  %v763_v61 = vpack.c.bf16 %v731_v58, %v731_v58  ;;  %v739_v62 = vsel %vm675_vm10, %v643_v49, %v707_v53  ;;  %v569_v5 = vadd.f32 %v499_v60, %v263_v59  ;;  %v577_v8 = vadd.f32 %v519_v1, %v271_v0 }
  0xcf   : > { %819 = vst.msk [vmem:[%s1230_s26 + $0x70] sm:$0xf] %vm790_vm4, %v786_v57  ;;  %v771_v2 = vpack.c.bf16 %v739_v62, %v739_v62 }
  0xd0   : > { %796 = vst.msk [vmem:[%s1230_s26 + $0x14] sm:$0xf] %vm790_vm4, %v763_v61  ;;  %v651_v4 = vld [vmem:[#allocation2 + $0xa8] sm:$0xff] }
  0xd1   : > { %804 = vst.msk [vmem:[%s1230_s26 + $0x34] sm:$0xf] %vm790_vm4, %v771_v2  ;;  %vm683_vm11 = vcmp.ge.f32.partialorder %v651_v4, 0.0  ;;  %v715_v6 = vmul.f32 0.2, %v651_v4  ;;  %v659_v7 = vld [vmem:[#allocation2 + $0xe8] sm:$0xff] }
  0xd2   : > { %vm691_vm12 = vcmp.ge.f32.partialorder %v659_v7, 0.0  ;;  %v723_v9 = vmul.f32 0.2, %v659_v7  ;;  %v636_v10 = vld [vmem:[#allocation2 + $0x30] sm:$0xff]  ;;  %617 = vst.msk [vmem:[#allocation2 + $0xb0] sm:$0xff] %vm223_vm1, %v584_v63 }
  0xd3   : > { %v747_v11 = vsel %vm683_vm11, %v651_v4, %v715_v6  ;;  %vm668_vm13 = vcmp.ge.f32.partialorder %v636_v10, 0.0  ;;  %v700_v12 = vmul.f32 0.2, %v636_v10  ;;  %v644_v13 = vld [vmem:[#allocation2 + $0x70] sm:$0xff]  ;;  %625 = vst.msk [vmem:[#allocation2 + $0xf0] sm:$0xff] %vm223_vm1, %v592_v3 }
  0xd4   : > { %v779_v15 = vpack.c.bf16 %v747_v11, %v747_v11  ;;  %v755_v16 = vsel %vm691_vm12, %v659_v7, %v723_v9  ;;  %vm676_vm14 = vcmp.ge.f32.partialorder %v644_v13, 0.0  ;;  %v708_v17 = vmul.f32 0.2, %v644_v13  ;;  %602 = vst.msk [vmem:[#allocation2 + $0x38] sm:$0xff] %vm223_vm1, %v569_v5  ;;  %v539_v18 = vpop.f32.mrf.mxu2  ;;  %v559_v20 = vpop.f32.mrf.mxu3 }
  0xd5   : > { %v787_v21 = vpack.c.bf16 %v755_v16, %v755_v16  ;;  %v732_v22 = vsel %vm668_vm13, %v636_v10, %v700_v12  ;;  %610 = vst.msk [vmem:[#allocation2 + $0x78] sm:$0xff] %vm223_vm1, %v577_v8  ;;  %v585_v25 = vadd.f32 %v539_v18, %v279_v14  ;;  %v593_v27 = vadd.f32 %v559_v20, %v287_v19 }
  0xd6   : > { %812 = vst.msk [vmem:[%s1230_s26 + $0x54] sm:$0xf] %vm790_vm4, %v779_v15  ;;  %v764_v23 = vpack.c.bf16 %v732_v22, %v732_v22  ;;  %v740_v24 = vsel %vm676_vm14, %v644_v13, %v708_v17 }
  0xd7   : > { %820 = vst.msk [vmem:[%s1230_s26 + $0x74] sm:$0xf] %vm790_vm4, %v787_v21  ;;  %v772_v26 = vpack.c.bf16 %v740_v24, %v740_v24 }
  0xd8   : > { %797 = vst.msk [vmem:[%s1230_s26 + $0x18] sm:$0xf] %vm790_vm4, %v764_v23 }
  0xd9   : > { %805 = vst.msk [vmem:[%s1230_s26 + $0x38] sm:$0xf] %vm790_vm4, %v772_v26  ;;  %v652_v28 = vld [vmem:[#allocation2 + $0xb0] sm:$0xff] }
  0xda   : > { %vm684_vm15 = vcmp.ge.f32.partialorder %v652_v28, 0.0  ;;  %v716_v29 = vmul.f32 0.2, %v652_v28  ;;  %v660_v30 = vld [vmem:[#allocation2 + $0xf0] sm:$0xff]  ;;  %618 = vst.msk [vmem:[#allocation2 + $0xb8] sm:$0xff] %vm223_vm1, %v585_v25 }
  0xdb   : > { %vm692_vm0 = vcmp.ge.f32.partialorder %v660_v30, 0.0  ;;  %v724_v31 = vmul.f32 0.2, %v660_v30  ;;  %v637_v32 = vld [vmem:[#allocation2 + $0x38] sm:$0xff]  ;;  %626 = vst.msk [vmem:[#allocation2 + $0xf8] sm:$0xff] %vm223_vm1, %v593_v27 }
  0xdc   : > { %v748_v33 = vsel %vm684_vm15, %v652_v28, %v716_v29  ;;  %vm669_vm2 = vcmp.ge.f32.partialorder %v637_v32, 0.0  ;;  %v701_v34 = vmul.f32 0.2, %v637_v32  ;;  %v645_v35 = vld [vmem:[#allocation2 + $0x78] sm:$0xff] }
  0xdd   : > { %v780_v36 = vpack.c.bf16 %v748_v33, %v748_v33  ;;  %v756_v37 = vsel %vm692_vm0, %v660_v30, %v724_v31  ;;  %vm677_vm3 = vcmp.ge.f32.partialorder %v645_v35, 0.0  ;;  %v709_v38 = vmul.f32 0.2, %v645_v35 }
  0xde   : > { %v788_v39 = vpack.c.bf16 %v756_v37, %v756_v37  ;;  %v733_v40 = vsel %vm669_vm2, %v637_v32, %v701_v34 }
  0xdf   : > { %813 = vst.msk [vmem:[%s1230_s26 + $0x58] sm:$0xf] %vm790_vm4, %v780_v36  ;;  %v765_v41 = vpack.c.bf16 %v733_v40, %v733_v40  ;;  %v741_v42 = vsel %vm677_vm3, %v645_v35, %v709_v38 }
  0xe0   : > { %821 = vst.msk [vmem:[%s1230_s26 + $0x78] sm:$0xf] %vm790_vm4, %v788_v39  ;;  %v773_v43 = vpack.c.bf16 %v741_v42, %v741_v42 }
  0xe1   : > { %798 = vst.msk [vmem:[%s1230_s26 + $0x1c] sm:$0xf] %vm790_vm4, %v765_v41  ;;  %v653_v44 = vld [vmem:[#allocation2 + $0xb8] sm:$0xff] }
  0xe2   : > { %806 = vst.msk [vmem:[%s1230_s26 + $0x3c] sm:$0xf] %vm790_vm4, %v773_v43  ;;  %vm685_vm1 = vcmp.ge.f32.partialorder %v653_v44, 0.0  ;;  %v717_v45 = vmul.f32 0.2, %v653_v44  ;;  %v661_v46 = vld [vmem:[#allocation2 + $0xf8] sm:$0xff] }
  0xe3   : > { %vm693_vm5 = vcmp.ge.f32.partialorder %v661_v46, 0.0  ;;  %v725_v47 = vmul.f32 0.2, %v661_v46 }
  0xe4   : > { %v749_v48 = vsel %vm685_vm1, %v653_v44, %v717_v45 }
  0xe5   : > { %v781_v49 = vpack.c.bf16 %v749_v48, %v749_v48  ;;  %v757_v50 = vsel %vm693_vm5, %v661_v46, %v725_v47 }
  0xe6   : > { %v789_v51 = vpack.c.bf16 %v757_v50, %v757_v50 }
  0xe7   : > { %814 = vst.msk [vmem:[%s1230_s26 + $0x5c] sm:$0xf] %vm790_vm4, %v781_v49 }
  0xe8   : > { %822 = vst.msk [vmem:[%s1230_s26 + $0x7c] sm:$0xf] %vm790_vm4, %v789_v51 }
  0xe9 PF: > { %s12_s11 = sadd.s32 1, %s1101_s11   ;;  %s1335_s9 = smov %s1097_s10 }
  0xea   : > { %p9_p5 = scmp.ge.s32.totalorder %s12_s11, 10   ;;  %s1336_s10 = smov %s1338_s12 }
  0xec   :  { %11 = sbr.rel (!%p9_p5) target bundleno = 2 (0x2), region = 69 }

</bundles_post_ra>
